<compile_context>
chip_gen: v7x
topology: tpu7x:2x2x1
jax: 0.10.0
libtpu: 0.0.40
codegen_flags: <defaults>
</compile_context>

<pallas_src>
import functools

import jax
import jax.numpy as jnp
from jax.experimental import pallas as pl
from jax.experimental.pallas import tpu as pltpu


def channel_attention_kernel(x_ref, w1t_ref, b1_ref, w2t_ref, b2_ref, o_ref,
                             sum_acc, max_acc, *, hw_true, hw_tile, needs_mask):
    # x_ref:   (bt, C, hw_tile)  current streaming tile of the activation
    # w1t_ref: (C, Cr)           fc1 weight, pre-transposed (VMEM-resident)
    # b1_ref:  (1, Cr)           fc1 bias
    # w2t_ref: (Cr, C)           fc2 weight, pre-transposed (VMEM-resident)
    # b2_ref:  (1, C)            fc2 bias
    # o_ref:   (bt, 1, C)        sigmoid attention weights (written on last step)
    # sum_acc/max_acc: (bt, C)   f32 accumulators, live across the HW grid axis
    j = pl.program_id(1)
    n_j = pl.num_programs(1)

    @pl.when(j == 0)
    def _init():
        sum_acc[...] = jnp.zeros_like(sum_acc)
        max_acc[...] = jnp.full_like(max_acc, -jnp.inf)

    x = x_ref[...]                                   # native dtype (bt, C, hw_tile)

    def update(x_for_sum, x_for_max):
        # Sum accumulates in f32 (bf16-safe); max stays in the native dtype
        # (exact) and only the (bt, C) partial is upcast before merging.
        sum_acc[...] += jnp.sum(x_for_sum.astype(jnp.float32), axis=-1)
        tile_max = jnp.max(x_for_max, axis=-1).astype(jnp.float32)
        max_acc[...] = jnp.maximum(max_acc[...], tile_max)

    if needs_mask:
        # Only the final HW tile overhangs the (un-padded) array; its trailing
        # lanes hold unspecified data, so mask BOTH reductions there and run a
        # plain (no iota / no select) update on every other tile.
        @pl.when(j < n_j - 1)
        def _plain():
            update(x, x)

        @pl.when(j == n_j - 1)
        def _masked():
            lane = jax.lax.broadcasted_iota(jnp.int32, (1, 1, hw_tile), 2)
            valid = (j * hw_tile + lane) < hw_true        # (1,1,hw_tile), broadcasts
            zero = jnp.zeros((), dtype=x.dtype)
            neg = jnp.asarray(-jnp.inf, dtype=x.dtype)
            update(jnp.where(valid, x, zero), jnp.where(valid, x, neg))
    else:
        update(x, x)

    @pl.when(j == n_j - 1)
    def _finalize():
        bt = sum_acc.shape[0]
        avg = sum_acc[...] * (1.0 / float(hw_true))       # true mean (un-padded H*W)
        mx = max_acc[...]
        # Single MLP pass over [avg; max] stacked along M: halves MXU pushes.
        stacked = jnp.concatenate([avg, mx], axis=0)      # (2*bt, C)
        h = jnp.dot(stacked, w1t_ref[...],
                    preferred_element_type=jnp.float32) + b1_ref[...]
        h = jnp.maximum(h, 0.0)                           # ReLU
        y = jnp.dot(h, w2t_ref[...],
                    preferred_element_type=jnp.float32) + b2_ref[...]
        logits = y[:bt, :] + y[bt:, :]
        o_ref[...] = jax.nn.sigmoid(logits).astype(o_ref.dtype)[:, None, :]


def _vmem_capacity_bytes(default=64 << 20):
    # Generation-aware: 128 MiB on v5e/v6e, 64 MiB per TensorCore on v7x.
    try:
        info = pltpu.get_tpu_info()
        cap = int(getattr(info, "vmem_capacity_bytes", default))
        return cap if cap > 0 else default
    except Exception:
        return default


def _pick_batch_tile(batch: int) -> int:
    # Guarantee >=2 blocks along the "parallel" batch axis whenever possible so
    # it can be sharded across TensorCores (v7x megacore); prefer
    # sublane-friendly multiples of 8, then any divisor down to 1.
    for bt in (32, 16, 8, 4, 2, 1):
        if batch % bt == 0 and batch // bt >= 2:
            return bt
    return batch


def channel_attention(x, w1, b1, w2, b2, *, max_hw_tile=None):
    """x: (B, C, H, W). w1: (Cr, C), b1: (Cr,), w2: (C, Cr), b2: (C,).

    Returns sigmoid attention weights of shape (B, C, 1, 1), matching PyTorch.
    """
    B, C, H, W = x.shape
    Cr = w1.shape[0]
    hw = H * W
    itemsize = jnp.dtype(x.dtype).itemsize

    bt = _pick_batch_tile(B)

    # Per-buffer streaming budget derived from physical VMEM so the same code
    # picks big tiles on 128 MiB parts and stays safe on v7x's 64 MiB.
    vmem_cap = _vmem_capacity_bytes()
    x_tile_budget = max(4 << 20, min(24 << 20, vmem_cap // 5))

    # Lane-dense HW tile: as large as the budget allows, then rebalanced across
    # tiles so the final tile's overhang past hw is < 128 lanes.  No padding of
    # x is done: overhanging lanes are garbage and are masked in-kernel on the
    # last tile only.
    hw_tile_max = max(128, (x_tile_budget // (bt * C * itemsize)) // 128 * 128)
    if max_hw_tile is not None:
        hw_tile_max = max(128, min(hw_tile_max, (max_hw_tile // 128) * 128))
    n_tiles = pl.cdiv(hw, hw_tile_max)
    hw_tile = pl.cdiv(pl.cdiv(hw, 128), n_tiles) * 128
    grid_j = pl.cdiv(hw, hw_tile)
    if grid_j == 1:
        # Single tile: use the exact (full-extent) block -> no overhang, no mask.
        hw_tile = hw
        needs_mask = False
    else:
        needs_mask = (hw % hw_tile) != 0

    x_flat = x.reshape(B, C, hw)          # contiguous dim merge: no HBM copy, no pad

    w1t = w1.T                            # (C, Cr)
    w2t = w2.T                            # (Cr, C)
    b1_2d = b1.reshape(1, Cr)
    b2_2d = b2.reshape(1, C)

    grid = (B // bt, grid_j)

    kernel = functools.partial(
        channel_attention_kernel,
        hw_true=hw, hw_tile=hw_tile, needs_mask=needs_mask)

    # VMEM budget: double-buffered x tiles + resident weights + scratch + headroom.
    x_tile_bytes = bt * C * hw_tile * itemsize
    weight_bytes = (2 * C * Cr + C + Cr) * 4
    scratch_bytes = 2 * bt * C * 4 + 2 * bt * C * itemsize
    vmem_needed = 2 * x_tile_bytes + 2 * weight_bytes + scratch_bytes + (4 << 20)
    vmem_limit = int(min(max(vmem_needed, 16 << 20), int(0.9 * vmem_cap)))

    cost = pl.CostEstimate(
        flops=2 * B * C * hw + 8 * B * C * Cr,       # pooling (add+max) + fused MLP
        transcendentals=B * C,                       # sigmoid
        bytes_accessed=B * C * hw * itemsize + B * C * itemsize + weight_bytes)

    grid_spec = pltpu.PrefetchScalarGridSpec(
        num_scalar_prefetch=0,
        grid=grid,
        in_specs=[
            # Streaming activation tiles.
            pl.BlockSpec((bt, C, hw_tile), lambda i, j: (i, 0, j)),
            # MLP params: constant index_map -> DMA'd once, VMEM-resident.
            pl.BlockSpec((C, Cr), lambda i, j: (0, 0)),
            pl.BlockSpec((1, Cr), lambda i, j: (0, 0)),
            pl.BlockSpec((Cr, C), lambda i, j: (0, 0)),
            pl.BlockSpec((1, C), lambda i, j: (0, 0)),
        ],
        # (bt, 1, C) keeps the blocked last-two dims equal to the full array
        # dims for any bt, so small-batch shapes can still split across cores.
        out_specs=pl.BlockSpec((bt, 1, C), lambda i, j: (i, 0, 0)),
        scratch_shapes=[pltpu.VMEM((bt, C), jnp.float32),   # running sum
                        pltpu.VMEM((bt, C), jnp.float32)],  # running max
    )

    out = pl.pallas_call(
        kernel,
        out_shape=jax.ShapeDtypeStruct((B, 1, C), x.dtype),
        grid_spec=grid_spec,
        compiler_params=pltpu.CompilerParams(
            dimension_semantics=("parallel", "arbitrary"),
            vmem_limit_bytes=vmem_limit),
        cost_estimate=cost,
    )(x_flat, w1t, b1_2d, w2t, b2_2d)

    return out.reshape(B, C, 1, 1)


def channel_attention_ref(x, w1, b1, w2, b2):
    avg = jnp.mean(x, axis=(2, 3))                 # (B, C)
    mx = jnp.max(x, axis=(2, 3))                   # (B, C)

    def mlp(v):
        h = jnp.maximum(v @ w1.T + b1, 0.0)
        return h @ w2.T + b2

    return jax.nn.sigmoid(mlp(avg) + mlp(mx))[:, :, None, None]


if __name__ == "__main__":
    # Small shapes consistent with the module: channels divisible by reduction.
    B, C, H, W = 2, 32, 16, 16
    reduction = 8
    Cr = C // reduction  # 4

    key = jax.random.PRNGKey(0)
    kx, k1, k2, k3, k4 = jax.random.split(key, 5)

    x = jax.random.normal(kx, (B, C, H, W), dtype=jnp.float32)
    # Conv2d 1x1 on a (B, C, 1, 1) tensor == dense layer; weights squeezed.
    w1 = jax.random.normal(k1, (Cr, C), dtype=jnp.float32) * 0.1   # fc1.weight
    b1 = jax.random.normal(k2, (Cr,), dtype=jnp.float32) * 0.1     # fc1.bias
    w2 = jax.random.normal(k3, (C, Cr), dtype=jnp.float32) * 0.1   # fc2.weight
    b2 = jax.random.normal(k4, (C,), dtype=jnp.float32) * 0.1      # fc2.bias

    # 1) Aligned HW (256 lanes), single tile, no masking.
    out = jax.block_until_ready(channel_attention(x, w1, b1, w2, b2))
    ref = channel_attention_ref(x, w1, b1, w2, b2)
    assert out.shape == (B, C, 1, 1)
    assert jnp.allclose(out, ref, atol=1e-5, rtol=1e-5)

    # 2) Ragged HW with multiple tiles: hw = 17*17 = 289, forced hw_tile = 128
    #    -> 3 HW tiles, last tile overhangs by 95 garbage lanes (masked path).
    x2 = jax.random.normal(kx, (B, C, 17, 17), dtype=jnp.float32)
    out2 = jax.block_until_ready(
        channel_attention(x2, w1, b1, w2, b2, max_hw_tile=128))
    ref2 = channel_attention_ref(x2, w1, b1, w2, b2)
    assert jnp.allclose(out2, ref2, atol=1e-5, rtol=1e-5)

    # 3) Ragged HW, single full-extent tile (no mask, no overhang): 15*15 = 225.
    x3 = jax.random.normal(kx, (B, C, 15, 15), dtype=jnp.float32)
    out3 = jax.block_until_ready(channel_attention(x3, w1, b1, w2, b2))
    ref3 = channel_attention_ref(x3, w1, b1, w2, b2)
    assert jnp.allclose(out3, ref3, atol=1e-5, rtol=1e-5)

    print("KERNEL_OK")
</pallas_src>

<mosaic_0001>
module attributes {stable_mosaic.version = 11 : i64} {
  func.func @channel_attention_kernel(%arg0: i32, %arg1: i32, %arg2: memref<1x32x256xf32, #tpu.memory_space<vmem>>, %arg3: memref<32x4xf32, #tpu.memory_space<vmem>>, %arg4: memref<1x4xf32, #tpu.memory_space<vmem>>, %arg5: memref<4x32xf32, #tpu.memory_space<vmem>>, %arg6: memref<1x32xf32, #tpu.memory_space<vmem>>, %arg7: memref<1x1x32xf32, #tpu.memory_space<vmem>>, %arg8: memref<1x32xf32, #tpu.memory_space<vmem>>, %arg9: memref<1x32xf32, #tpu.memory_space<vmem>>) attributes {dimension_semantics = [#tpu.dimension_semantics<parallel>, #tpu.dimension_semantics<arbitrary>], iteration_bounds = array<i64: 2, 1>, scalar_prefetch = 0 : i64, scratch_operands = 2 : i64, tpu.core_type = #tpu.core_type<tc>, window_params = [{transform_indices = @transform_0, window_bounds = array<i64: 1, 32, 256>}, {pipeline_mode = #tpu.pipeline_mode<synchronous>, transform_indices = @transform_1, window_bounds = array<i64: 32, 4>}, {pipeline_mode = #tpu.pipeline_mode<synchronous>, transform_indices = @transform_2, window_bounds = array<i64: 1, 4>}, {pipeline_mode = #tpu.pipeline_mode<synchronous>, transform_indices = @transform_3, window_bounds = array<i64: 4, 32>}, {pipeline_mode = #tpu.pipeline_mode<synchronous>, transform_indices = @transform_4, window_bounds = array<i64: 1, 32>}, {transform_indices = @transform_5, window_bounds = array<i64: 1, 1, 32>}]} {
    %c0_i32 = arith.constant 0 : i32
    %0 = arith.cmpi eq, %arg1, %c0_i32 : i32
    %1 = arith.extui %0 : i1 to i32
    %c0_i32_0 = arith.constant 0 : i32
    %2 = arith.cmpi ne, %1, %c0_i32_0 : i32
    scf.if %2 {
      %cst_14 = arith.constant 0.000000e+00 : f32
      %15 = vector.broadcast %cst_14 : f32 to vector<1x32xf32>
      %c0_15 = arith.constant 0 : index
      %c0_16 = arith.constant 0 : index
      %16 = vector.load %arg8[%c0_15, %c0_16] : memref<1x32xf32, #tpu.memory_space<vmem>>, vector<1x32xf32>
      tpu.vector_store %arg8[%c0_15, %c0_16], %15 {strides = array<i32>} : memref<1x32xf32, #tpu.memory_space<vmem>>, vector<1x32xf32>,
      %cst_17 = arith.constant 0xFF800000 : f32
      %17 = vector.broadcast %cst_17 : f32 to vector<1x32xf32>
      %c0_18 = arith.constant 0 : index
      %c0_19 = arith.constant 0 : index
      %18 = vector.load %arg9[%c0_18, %c0_19] : memref<1x32xf32, #tpu.memory_space<vmem>>, vector<1x32xf32>
      tpu.vector_store %arg9[%c0_18, %c0_19], %17 {strides = array<i32>} : memref<1x32xf32, #tpu.memory_space<vmem>>, vector<1x32xf32>,
    } else {
    }
    %c0 = arith.constant 0 : index
    %c0_1 = arith.constant 0 : index
    %c0_2 = arith.constant 0 : index
    %3 = vector.load %arg2[%c0, %c0_1, %c0_2] : memref<1x32x256xf32, #tpu.memory_space<vmem>>, vector<1x32x256xf32>
    %c0_3 = arith.constant 0 : index
    %c0_4 = arith.constant 0 : index
    %4 = vector.load %arg8[%c0_3, %c0_4] : memref<1x32xf32, #tpu.memory_space<vmem>>, vector<1x32xf32>
    %cst = arith.constant dense<0.000000e+00> : vector<1x32xf32>
    %5 = vector.multi_reduction <add>, %3, %cst [2] : vector<1x32x256xf32> to vector<1x32xf32>
    %6 = arith.addf %4, %5 : vector<1x32xf32>
    %c0_5 = arith.constant 0 : index
    %c0_6 = arith.constant 0 : index
    %7 = vector.load %arg8[%c0_5, %c0_6] : memref<1x32xf32, #tpu.memory_space<vmem>>, vector<1x32xf32>
    tpu.vector_store %arg8[%c0_5, %c0_6], %6 {strides = array<i32>} : memref<1x32xf32, #tpu.memory_space<vmem>>, vector<1x32xf32>,
    %cst_7 = arith.constant dense<0xFF800000> : vector<1x32xf32>
    %8 = vector.multi_reduction <maximumf>, %3, %cst_7 [2] : vector<1x32x256xf32> to vector<1x32xf32>
    %c0_8 = arith.constant 0 : index
    %c0_9 = arith.constant 0 : index
    %9 = vector.load %arg9[%c0_8, %c0_9] : memref<1x32xf32, #tpu.memory_space<vmem>>, vector<1x32xf32>
    %10 = arith.maximumf %9, %8 : vector<1x32xf32>
    %c0_10 = arith.constant 0 : index
    %c0_11 = arith.constant 0 : index
    %11 = vector.load %arg9[%c0_10, %c0_11] : memref<1x32xf32, #tpu.memory_space<vmem>>, vector<1x32xf32>
    tpu.vector_store %arg9[%c0_10, %c0_11], %10 {strides = array<i32>} : memref<1x32xf32, #tpu.memory_space<vmem>>, vector<1x32xf32>,
    %c0_i32_12 = arith.constant 0 : i32
    %12 = arith.cmpi eq, %arg1, %c0_i32_12 : i32
    %13 = arith.extui %12 : i1 to i32
    %c0_i32_13 = arith.constant 0 : i32
    %14 = arith.cmpi ne, %13, %c0_i32_13 : i32
    scf.if %14 {
      %c0_14 = arith.constant 0 : index
      %c0_15 = arith.constant 0 : index
      %15 = vector.load %arg8[%c0_14, %c0_15] : memref<1x32xf32, #tpu.memory_space<vmem>>, vector<1x32xf32>
      %cst_16 = arith.constant 3.906250e-03 : f32
      %16 = vector.broadcast %cst_16 : f32 to vector<1x32xf32>
      %17 = arith.mulf %15, %16 : vector<1x32xf32>
      %c0_17 = arith.constant 0 : index
      %c0_18 = arith.constant 0 : index
      %18 = vector.load %arg9[%c0_17, %c0_18] : memref<1x32xf32, #tpu.memory_space<vmem>>, vector<1x32xf32>
      %19 = tpu.concatenate %17, %18 in 0 : vector<1x32xf32>, vector<1x32xf32> -> vector<2x32xf32>
      %c0_19 = arith.constant 0 : index
      %c0_20 = arith.constant 0 : index
      %20 = vector.load %arg3[%c0_19, %c0_20] : memref<32x4xf32, #tpu.memory_space<vmem>>, vector<32x4xf32>
      %cst_21 = arith.constant dense<0.000000e+00> : vector<2x4xf32>
      %21 = tpu.matmul %19, %20, %cst_21 {dimension_numbers = #tpu.dot_dimension_numbers<[1], [0], [0], [1], [0, 0, 1, 1], [], []>} : vector<2x32xf32>, vector<32x4xf32>, vector<2x4xf32> -> vector<2x4xf32>
      %c0_22 = arith.constant 0 : index
      %c0_23 = arith.constant 0 : index
      %22 = vector.load %arg4[%c0_22, %c0_23] : memref<1x4xf32, #tpu.memory_space<vmem>>, vector<1x4xf32>
      %23 = vector.broadcast %22 : vector<1x4xf32> to vector<2x4xf32>
      %24 = arith.addf %21, %23 : vector<2x4xf32>
      %cst_24 = arith.constant 0.000000e+00 : f32
      %25 = vector.broadcast %cst_24 : f32 to vector<2x4xf32>
      %26 = arith.maximumf %24, %25 : vector<2x4xf32>
      %c0_25 = arith.constant 0 : index
      %c0_26 = arith.constant 0 : index
      %27 = vector.load %arg5[%c0_25, %c0_26] : memref<4x32xf32, #tpu.memory_space<vmem>>, vector<4x32xf32>
      %cst_27 = arith.constant dense<0.000000e+00> : vector<2x32xf32>
      %28 = tpu.matmul %26, %27, %cst_27 {dimension_numbers = #tpu.dot_dimension_numbers<[1], [0], [0], [1], [0, 0, 1, 1], [], []>} : vector<2x4xf32>, vector<4x32xf32>, vector<2x32xf32> -> vector<2x32xf32>
      %c0_28 = arith.constant 0 : index
      %c0_29 = arith.constant 0 : index
      %29 = vector.load %arg6[%c0_28, %c0_29] : memref<1x32xf32, #tpu.memory_space<vmem>>, vector<1x32xf32>
      %30 = vector.broadcast %29 : vector<1x32xf32> to vector<2x32xf32>
      %31 = arith.addf %28, %30 : vector<2x32xf32>
      %32 = vector.extract_strided_slice %31 {offsets = [0, 0], sizes = [1, 32], strides = [1, 1]} : vector<2x32xf32> to vector<1x32xf32>
      %33 = vector.extract_strided_slice %31 {offsets = [1, 0], sizes = [1, 32], strides = [1, 1]} : vector<2x32xf32> to vector<1x32xf32>
      %34 = arith.addf %32, %33 : vector<1x32xf32>
      %35 = arith.negf %34 : vector<1x32xf32>
      %36 = math.exp %35 : vector<1x32xf32>
      %cst_30 = arith.constant 1.000000e+00 : f32
      %37 = vector.broadcast %cst_30 : f32 to vector<1x32xf32>
      %38 = arith.addf %37, %36 : vector<1x32xf32>
      %39 = arith.divf %37, %38 : vector<1x32xf32>
      %40 = vector.shape_cast %39 : vector<1x32xf32> to vector<1x1x32xf32>
      %c0_31 = arith.constant 0 : index
      %c0_32 = arith.constant 0 : index
      %c0_33 = arith.constant 0 : index
      %41 = vector.load %arg7[%c0_31, %c0_32, %c0_33] : memref<1x1x32xf32, #tpu.memory_space<vmem>>, vector<1x1x32xf32>
      tpu.vector_store %arg7[%c0_31, %c0_32, %c0_33], %40 {strides = array<i32>} : memref<1x1x32xf32, #tpu.memory_space<vmem>>, vector<1x1x32xf32>,
    } else {
    }
    return
  }
  func.func @transform_0(%arg0: i32, %arg1: i32) -> (i32, i32, i32) {
    %c0_i32 = arith.constant 0 : i32
    %c0_i32_0 = arith.constant 0 : i32
    return %arg0, %c0_i32, %arg1 : i32, i32, i32
  }
  func.func @transform_1(%arg0: i32, %arg1: i32) -> (i32, i32) {
    %c0_i32 = arith.constant 0 : i32
    %c0_i32_0 = arith.constant 0 : i32
    %c0_i32_1 = arith.constant 0 : i32
    return %c0_i32, %c0_i32_0 : i32, i32
  }
  func.func @transform_2(%arg0: i32, %arg1: i32) -> (i32, i32) {
    %c0_i32 = arith.constant 0 : i32
    %c0_i32_0 = arith.constant 0 : i32
    %c0_i32_1 = arith.constant 0 : i32
    return %c0_i32, %c0_i32_0 : i32, i32
  }
  func.func @transform_3(%arg0: i32, %arg1: i32) -> (i32, i32) {
    %c0_i32 = arith.constant 0 : i32
    %c0_i32_0 = arith.constant 0 : i32
    %c0_i32_1 = arith.constant 0 : i32
    return %c0_i32, %c0_i32_0 : i32, i32
  }
  func.func @transform_4(%arg0: i32, %arg1: i32) -> (i32, i32) {
    %c0_i32 = arith.constant 0 : i32
    %c0_i32_0 = arith.constant 0 : i32
    %c0_i32_1 = arith.constant 0 : i32
    return %c0_i32, %c0_i32_0 : i32, i32
  }
  func.func @transform_5(%arg0: i32, %arg1: i32) -> (i32, i32, i32) {
    %c0_i32 = arith.constant 0 : i32
    %c0_i32_0 = arith.constant 0 : i32
    %c0_i32_1 = arith.constant 0 : i32
    return %arg0, %c0_i32, %c0_i32_0 : i32, i32, i32
  }
}

</mosaic_0001>

<bundles_post_ra>
// kernel: tpu_custom_call.1
= control target key start
LH: loop header
LB: loop body
LE: loop exit
PB: predicated region body
PF: predicated region fallthrough
CT: control target
= control target key end

     0   :  { %10 = vsyncpa [#allocation5], 0  ;;  %s1984_s0 = inlined_call_operand.hbm [shape: f32[2,32,256], index: 0, kind: input, shape index: {}]   ;;  %s1985_s1 = inlined_call_operand.vmem [shape: f32[32,4], index: 1, kind: input, shape index: {}]   ;;  %s1986_s2 = inlined_call_operand.vmem [shape: f32[1,4], index: 2, kind: input, shape index: {}]   ;;  %s1987_s3 = inlined_call_operand.vmem [shape: f32[4,32], index: 3, kind: input, shape index: {}]   ;;  %s1988_s4 = inlined_call_operand.vmem [shape: f32[1,32], index: 4, kind: input, shape index: {}]   ;;  %s1989_s5 = inlined_call_operand.hbm [shape: f32[2,1,32], index: 5, kind: output, shape index: {}]  }
   0x1   :  { %12 = vsyncpa [#allocation5 + $0x1], 0 }
   0x2   :  { %13 = vsyncpa [#allocation6], 0 }
   0x3   :  { %15 = vsyncpa [#allocation6 + $0x1], 0  ;;  %s1627_s18 = smov 0   ;;  %s1629_s19 = smov 0  }
   0x4   :  { %s1631_s20 = smov 0   ;;  %s1633_s21 = smov 0  }
   0x5   :  { %s1635_s22 = smov 0   ;;  %s1637_s23 = smov 0  }
   0x6 LB: > { %s1348_s24 = sadd.s32 4294967295, %s1585_s23   ;;  %s1349_s25 = sadd.s32 4294967294, %s1585_s23   ;;  %s1585_s23 = sphi %s1637_s23, %s21_s23   ;;  %s1581_s22 = sphi %s1635_s22, %s2004_s22   ;;  %s1577_s21 = sphi %s1633_s21, %s2003_s21   ;;  %s1573_s20 = sphi %s1631_s20, %s2002_s20   ;;  %s1569_s19 = sphi %s1629_s19, %s2001_s19   ;;  %s1565_s18 = sphi %s1627_s18, %s2000_s18  }
   0x7   : > { %s33_s26 = sadd.s32 1, %s1581_s22  ;;  %s42_s27 = sadd.s32 1, %s1573_s20 }
   0x8   : > { %p35_p0 = scmp.ge.s32.totalorder %s33_s26, 2  ;;  %p49_p1 = scmp.ne.s32.totalorder %s1573_s20, %s1569_s19 }
   0x9   : > { %p50_p2 = scmp.eq.s32.totalorder %s1585_s23, 0  ;;  %p55_p3 = scmp.ne.s32.totalorder %s1569_s19, %s1565_s18 }
   0xa   : > { %s2006_s26 = smov (%p35_p0, %s33_s26), 0  ;;  %p56_p5 = scmp.eq.s32.totalorder %s1348_s24, 0 }
   0xb   : > { %p1668_p4 = por %p50_p2, %p49_p1  ;;  %s37_s29 = ssub.s32 %s1581_s22, %s2006_s26 }
   0xc   : > { %p163_p6 = scmp.eq.s32.totalorder %s1348_s24, 1  ;;  %p40_p7 = scmp.eq.s32.totalorder %s37_s29, 0 }
   0xd   : > { %p1674_p8 = por %p56_p5, %p55_p3  ;;  %p169_p10 = scmp.eq.s32.totalorder %s1349_s25, 1 }
   0xe   : > { %p1678_p9 = por %p163_p6, %p49_p1  ;;  %p1409_p13 = scmp.lt.s32.totalorder %s1585_s23, 2 }
   0xf   : > { %s1683_s7 = scalar_select %p40_p7, %s1573_s20, %s42_s27  }
  0x10   : > { %s1993_s6 = scalar_select %p1678_p9, 1, 0 }
  0x11   : > { %p1685_p11 = por %p169_p10, %p55_p3  ;;  %s201_s9 = sand.u32 1, %s1573_s20  }
  0x12   : > { %s1352_s10 = sshll.u32 %s201_s9, 6  ;;  %s1367_s11 = sshll.u32 %s1581_s22, 10 }
  0x13   : > { %s1994_s8 = scalar_select %p1685_p11, 1, 0 }
  0x14   : > { %s1696_s14 = scalar_lea.hbm %s1984_s0, %s1367_s11  ;;  %s205_s15 = scalar_lea.vmem [#allocation4], %s1352_s10 }
  0x15   : > { %s214_s16 = sshll.u32 %s205_s15, 4  ;;  %p1702_p0 = pnand %p1409_p13, %p1668_p4  ;;  %s1698_s16 = int_to_ptr.vmem [resolvable:$true] %s214_s16 }
  0x16   : > { %s1707_s24 = scalar_lea.sflag [#allocation5], %s201_s9  ;;  %s1473_s25 = scalar_lea.hbm %s1696_s14, 1024 }
  0x17   : > { %p1474_p2 = scmp.ne.s32.totalorder %s1696_s14, %s1473_s25  ;;  %p1475_p3 = pneg %p1702_p0 }
  0x18   : > { %s1478_s28 = scalar_lea.hbm %s1984_s0, 2048  ;;  %p1479_p4 = scmp.lt.u32.totalorder %s1696_s14, %s1984_s0 }
  0x19   : > { %p1476_p5 = pnand %p1475_p3, %p1474_p2  ;;  %p1480_p7 = scmp.lt.u32.totalorder %s1478_s28, %s1473_s25 }
  0x1a   : > { %p1482_p13 = scmp.lt.u32.totalorder %s1473_s25, %s1696_s14 }
  0x1b   : > { %p1477_p6 = pneg %p1476_p5  ;;  %p1481_p10 = por %p1480_p7, %p1479_p4 }
  0x1d   : > { %p1483_p12 = por %p1482_p13, %p1481_p10 }
  0x1f   : > { %p1484_p1 = pnand %p1483_p12, %p1477_p6 }
  0x21   : > { %1487 = shalt.err (!%p1484_p1)
}
  0x22   : > { %s1488_s9 = scalar_lea.vmem %s1698_s16, 1024  ;;  %s1587_s12 = smov [#allocation4]  }
  0x23   : > { %p1489_p2 = scmp.ne.s32.totalorder %s1698_s16, %s1488_s9  ;;  %s1493_s13 = sshll.u32 %s1587_s12, 4  ;;  %s1494_s13 = int_to_ptr.vmem [resolvable:$false] %s1493_s13 }
  0x24   : > { %s1495_s15 = scalar_lea.vmem %s1494_s13, 2048  ;;  %p1496_p9 = scmp.lt.s32.totalorder %s1698_s16, %s1494_s13 }
  0x25   : > { %p1491_p5 = pnand %p1489_p2, %p1475_p3  ;;  %p1497_p4 = scmp.lt.s32.totalorder %s1495_s15, %s1488_s9 }
  0x27   : > { %p1492_p11 = pneg %p1491_p5  ;;  %p1498_p7 = por %p1497_p4, %p1496_p9 }
  0x29   : > { %p1499_p10 = pnand %p1498_p7, %p1492_p11 }
  0x2b   : > { %1502 = shalt.err (!%p1499_p10)
}
  0x2c   : > { %s1588_s25 = smov 256   ;;  %s1589_s27 = smov 16  }
  0x2d   : > { %1404 = dma.hbm_to_vmem [thread:$0]  (!%p1702_p0), %s1696_s14, 1024, %s1698_s16, %s1707_s24, %s1588_s25, %s1588_s25, %s1589_s27  }
  0x2e   : > { %p222_p12 = scmp.lt.s32.totalorder %s1585_s23, 3  ;;  %p1996_p1 = scmp.ge.s32.totalorder %s1585_s23, 1 }
  0x30   : > { %p223_p3 = pnand %p1996_p1, %p222_p12 }
  0x31   : > { %s1739_s29 = sand.u32 (!%p223_p3), 1, %s1569_s19  }
  0x32   : > { %226 = sbr.rel (%p223_p3) target bundleno = 872 (0x368), region = 40  ;;  %s1356_s28 = sshll.u32 (!%p223_p3), %s1739_s29, 6 }
  0x33   : > { %s229_s10 = scalar_lea.sflag (!%p223_p3), [#allocation5], %s1739_s29  ;;  %s232_s11 = scalar_lea.vmem (!%p223_p3), [#allocation4], %s1356_s28 }
  0x39   : > { %1556 = dma.done.wait (%p1674_p8), %s229_s10, 1024  }
  0x3a   : > { %1558 = vsyncadd (%p1674_p8), %s229_s10, 4294966272  ;;  %v266_v0 = vld [vmem:[%s232_s11] sm:$0xff]  ;;  %v267_v1 = vld [vmem:[%s232_s11 + $0x8] sm:$0xff]  ;;  %v1590_v16 = vmov 0   ;;  %v291_v17 = vlaneseq  ;;  %v1591_v18 = vmov 1966171168  }
  0x3b   : > { %v268_v2 = vld [vmem:[%s232_s11 + $0x10] sm:$0xff]  ;;  %v275_v3 = vadd.f32 %v267_v1, %v266_v0  ;;  %v269_v4 = vld [vmem:[%s232_s11 + $0x18] sm:$0xff]  ;;  %v270_v5 = vld [vmem:[%s232_s11 + $0x20] sm:$0xff]  ;;  %v672_v12 = vmax.f32 %v266_v0, %v267_v1  ;;  %1467 = vset.pattern.permute.xlu0 %v1590_v16  ;;  %1468 = vset.pattern.permute.xlu1 %v1590_v16  ;;  %v424_v19 = vunpack.c.l.s4 %v1591_v18  ;;  %vm263_vm0 = vcmask 253952   ;;  %s1364_s30 = sshll.u32 %s1577_s21, 4  ;;  %s257_s14 = scalar_lea.vmem [#allocation7], %s1739_s29 }
  0x3c   : > { %v271_v6 = vld [vmem:[%s232_s11 + $0x28] sm:$0xff]  ;;  %v272_v8 = vld [vmem:[%s232_s11 + $0x30] sm:$0xff]  ;;  %v273_v9 = vld [vmem:[%s232_s11 + $0x38] sm:$0xff]  ;;  %v278_v10 = vadd.f32 %v269_v4, %v268_v2  ;;  %v675_v13 = vmax.f32 %v268_v2, %v269_v4  ;;  %v1748_v20 = vshrl.u32 %v291_v17, 7  ;;  %vm1595_vm1 = vmmov 0   ;;  %s1271_s16 = sshll.u32 %s257_s14, 4  ;;  %s1934_s9 = scalar_lea.hbm %s1989_s5, %s1364_s30  ;;  %s1936_s16 = int_to_ptr.vmem [resolvable:$true] %s1271_s16 }
  0x3d   : > { %v281_v7 = vadd.f32 %v271_v6, %v270_v5  ;;  %276 = vadd.xlane.f32.xlu0 %v275_v3  ;;  %v284_v11 = vadd.f32 %v273_v9, %v272_v8  ;;  %v678_v14 = vmax.f32 %v270_v5, %v271_v6  ;;  %v681_v15 = vmax.f32 %v272_v8, %v273_v9  ;;  %s1259_s12 = scalar_lea.sflag [#allocation6], %s1739_s29  ;;  %s1503_s13 = scalar_lea.vmem %s1936_s16, 16 }
  0x3e   : > { %v425_v21 = vunpack.c.0.s8 %v424_v19  ;;  %v1751_v22 = vsub.s32 0, %v1748_v20  ;;  %v1754_v23 = vsub.s32 1, %v1748_v20  ;;  %v1757_v24 = vsub.s32 2, %v1748_v20  ;;  %p1504_p8 = scmp.ne.s32.totalorder %s1936_s16, %s1503_s13  ;;  %p1997_p9 = scmp.ne.s32.totalorder %s1993_s6, 0 }
  0x3f   : > { %282 = vadd.xlane.f32.xlu1 %v281_v7  ;;  %v1760_v25 = vsub.s32 3, %v1748_v20  ;;  %v1763_v26 = vsub.s32 4, %v1748_v20  ;;  %v1766_v27 = vsub.s32 5, %v1748_v20  ;;  %v1769_v28 = vsub.s32 6, %v1748_v20  ;;  %s1596_s21 = smov [#allocation7]  }
  0x40   : > { %v1772_v29 = vsub.s32 7, %v1748_v20  ;;  %v1775_v31 = vsub.s32 %v425_v21, %v1748_v20  ;;  %vm638_vm2 = vcmask 130112   ;;  %vm645_vm3 = vcmask 195712   ;;  %p1505_p11 = pnand %p1504_p8, %p1997_p9  ;;  %s1507_s15 = sshll.u32 %s1596_s21, 4  ;;  %s1508_s15 = int_to_ptr.vmem [resolvable:$false] %s1507_s15 }
  0x41   : > { %279 = vadd.xlane.f32.xlu0 %v278_v10  ;;  %vm652_vm4 = vcmask 261312   ;;  %vm1073_vm5 = vcmask 1040384   ;;  %vm1086_vm6 = vcmask 261120   ;;  %vm1173_vm7 = vcmask 1043456   ;;  %s1509_s25 = scalar_lea.vmem %s1508_s15, 32  ;;  %p1510_p6 = scmp.lt.s32.totalorder %s1936_s16, %s1508_s15 }
  0x42   : > { %vm1169_vm8 = vcmask 31744   ;;  %p1506_p0 = pneg %p1505_p11  ;;  %p1511_p13 = scmp.lt.s32.totalorder %s1509_s25, %s1503_s13 }
  0x43   : > { %285 = vadd.xlane.f32.xlu1 %v284_v11 }
  0x44   : > { %p1512_p2 = por %p1511_p13, %p1510_p6 }
  0x45   : > { %673 = vmax.xlane.f32.xlu0 %v672_v12 }
  0x46   : > { %p1513_p5 = pnand %p1512_p2, %p1506_p0 }
  0x47   : > { %676 = vmax.xlane.f32.xlu1 %v675_v13 }
  0x49   : > { %679 = vmax.xlane.f32.xlu0 %v678_v14 }
  0x4b   : > { %682 = vmax.xlane.f32.xlu1 %v681_v15 }
  0xca   : > { %v277_v30 = vpop.xlane.xlu0 %276 }
  0xcb   : > { %v294_v33 = vrot.slane %v277_v30, %v1751_v22  ;;  %v298_v34 = vrot.slane %v277_v30, %v1754_v23  ;;  %v302_v35 = vrot.slane %v277_v30, %v1757_v24  ;;  %v306_v36 = vrot.slane %v277_v30, %v1760_v25 }
  0xcc   : > { %v283_v32 = vpop.xlane.xlu1 %282  ;;  %v310_v37 = vrot.slane %v277_v30, %v1763_v26  ;;  %v314_v38 = vrot.slane %v277_v30, %v1766_v27  ;;  %v318_v39 = vrot.slane %v277_v30, %v1769_v28  ;;  %v322_v40 = vrot.slane %v277_v30, %v1772_v29 }
  0xcd   : > { %v419_v41 = vcombine.low %v294_v33, %v298_v34  ;;  %v420_v42 = vcombine.low %v302_v35, %v306_v36  ;;  %v358_v43 = vrot.slane %v283_v32, %v1751_v22  ;;  %v362_v44 = vrot.slane %v283_v32, %v1754_v23 }
  0xce   : > { %v280_v45 = vpop.xlane.xlu0 %279  ;;  %v421_v46 = vcombine.low %v310_v37, %v314_v38  ;;  %v422_v47 = vcombine.low %v318_v39, %v322_v40  ;;  %v366_v48 = vrot.slane %v283_v32, %v1757_v24  ;;  %v370_v49 = vrot.slane %v283_v32, %v1760_v25 }
  0xcf   : > { %v429_v50 = vrot.slane %v419_v41, %v1775_v31  ;;  %v436_v51 = vrot.slane %v420_v42, %v1775_v31  ;;  %v326_v52 = vrot.slane %v280_v45, %v1751_v22  ;;  %v330_v53 = vrot.slane %v280_v45, %v1754_v23 }
  0xd0   : > { %v443_v54 = vrot.slane %v421_v46, %v1775_v31  ;;  %v450_v55 = vrot.slane %v422_v47, %v1775_v31  ;;  %v334_v56 = vrot.slane %v280_v45, %v1757_v24  ;;  %v338_v57 = vrot.slane %v280_v45, %v1760_v25  ;;  %v286_v6 = vpop.xlane.xlu1 %285 }
  0xd1   : > { %v451_v58 = vcombine.low %v429_v50, %v436_v51  ;;  %v342_v59 = vrot.slane %v280_v45, %v1763_v26  ;;  %v346_v60 = vrot.slane %v280_v45, %v1766_v27  ;;  %v350_v61 = vrot.slane %v280_v45, %v1769_v28 }
  0xd2   : > { %v452_v62 = vcombine.low %v443_v54, %v450_v55  ;;  %v354_v63 = vrot.slane %v280_v45, %v1772_v29  ;;  %v468_v0 = vcombine.low %v326_v52, %v330_v53  ;;  %v469_v1 = vcombine.low %v334_v56, %v338_v57  ;;  %v674_v42 = vpop.xlane.xlu0 %673 }
  0xd3   : > { %v459_v2 = vrot.slane %v451_v58, %v1775_v31  ;;  %v470_v3 = vcombine.low %v342_v59, %v346_v60  ;;  %v374_v4 = vrot.slane %v283_v32, %v1763_v26  ;;  %v378_v5 = vrot.slane %v283_v32, %v1766_v27 }
  0xd4   : > { %v466_v7 = vrot.slane %v452_v62, %v1775_v31  ;;  %v471_v8 = vcombine.low %v350_v61, %v354_v63  ;;  %v478_v9 = vrot.slane %v468_v0, %v1775_v31  ;;  %v485_v10 = vrot.slane %v469_v1, %v1775_v31  ;;  %v677_v59 = vpop.xlane.xlu1 %676 }
  0xd5   : > { %v492_v11 = vrot.slane %v470_v3, %v1775_v31  ;;  %v382_v12 = vrot.slane %v283_v32, %v1769_v28  ;;  %v386_v13 = vrot.slane %v283_v32, %v1772_v29  ;;  %v517_v14 = vcombine.low %v358_v43, %v362_v44 }
  0xd6   : > { %v467_v15 = vcombine.low %v459_v2, %v466_v7  ;;  %v499_v16 = vrot.slane %v471_v8, %v1775_v31  ;;  %v500_v18 = vcombine.low %v478_v9, %v485_v10  ;;  %v518_v19 = vcombine.low %v366_v48, %v370_v49 }
  0xd7   : > { %v519_v21 = vcombine.low %v374_v4, %v378_v5  ;;  %v520_v30 = vcombine.low %v382_v12, %v386_v13  ;;  %v527_v33 = vrot.slane %v517_v14, %v1775_v31  ;;  %v390_v34 = vrot.slane %v286_v6, %v1751_v22 }
  0xd8   : > { %616 = vperm.xlu0 %1467, %v467_v15   ;;  %v501_v35 = vcombine.low %v492_v11, %v499_v16  ;;  %v508_v36 = vrot.slane %v500_v18, %v1775_v31  ;;  %v534_v37 = vrot.slane %v518_v19, %v1775_v31  ;;  %v394_v32 = vrot.slane %v286_v6, %v1754_v23 }
  0xd9   : > { %v541_v38 = vrot.slane %v519_v21, %v1775_v31  ;;  %v548_v39 = vrot.slane %v520_v30, %v1775_v31  ;;  %v398_v40 = vrot.slane %v286_v6, %v1757_v24  ;;  %v402_v41 = vrot.slane %v286_v6, %v1760_v25  ;;  %v680_v30 = vpop.xlane.xlu0 %679 }
  0xda   : > { %v515_v43 = vrot.slane %v501_v35, %v1775_v31  ;;  %v549_v44 = vcombine.low %v527_v33, %v534_v37  ;;  %v406_v45 = vrot.slane %v286_v6, %v1763_v26  ;;  %v410_v46 = vrot.slane %v286_v6, %v1766_v27 }
  0xdb   : > { %v550_v47 = vcombine.low %v541_v38, %v548_v39  ;;  %v414_v48 = vrot.slane %v286_v6, %v1769_v28  ;;  %v418_v49 = vrot.slane %v286_v6, %v1772_v29  ;;  %v566_v50 = vcombine.low %v390_v34, %v394_v32 }
  0xdc   : > { %v516_v51 = vcombine.low %v508_v36, %v515_v43  ;;  %v557_v52 = vrot.slane %v549_v44, %v1775_v31  ;;  %v567_v53 = vcombine.low %v398_v40, %v402_v41  ;;  %v568_v54 = vcombine.low %v406_v45, %v410_v46 }
  0xdd   : > { %v564_v55 = vrot.slane %v550_v47, %v1775_v31  ;;  %v569_v56 = vcombine.low %v414_v48, %v418_v49  ;;  %v576_v57 = vrot.slane %v566_v50, %v1775_v31  ;;  %v692_v58 = vrot.slane %v674_v42, %v1751_v22 }
  0xde   : > { %619 = vperm.xlu1 %1468, %v516_v51   ;;  %v583_v60 = vrot.slane %v567_v53, %v1775_v31  ;;  %v590_v61 = vrot.slane %v568_v54, %v1775_v31  ;;  %v696_v62 = vrot.slane %v674_v42, %v1754_v23  ;;  %v700_v63 = vrot.slane %v674_v42, %v1757_v24 }
  0xdf   : > { %v565_v0 = vcombine.low %v557_v52, %v564_v55  ;;  %v597_v1 = vrot.slane %v569_v56, %v1775_v31  ;;  %v704_v2 = vrot.slane %v674_v42, %v1760_v25  ;;  %v708_v3 = vrot.slane %v674_v42, %v1763_v26  ;;  %v683_v52 = vpop.xlane.xlu1 %682 }
  0xe0   : > { %v598_v4 = vcombine.low %v576_v57, %v583_v60  ;;  %v712_v5 = vrot.slane %v674_v42, %v1766_v27  ;;  %v716_v6 = vrot.slane %v674_v42, %v1769_v28  ;;  %v720_v7 = vrot.slane %v674_v42, %v1772_v29 }
  0xe1   : > { %v599_v8 = vcombine.low %v590_v61, %v597_v1  ;;  %v817_v9 = vcombine.low %v692_v58, %v696_v62  ;;  %v818_v10 = vcombine.low %v700_v63, %v704_v2  ;;  %v724_v11 = vrot.slane %v677_v59, %v1751_v22 }
  0xe2   : > { %622 = vperm.xlu1 %1468, %v565_v0   ;;  %v606_v12 = vrot.slane %v598_v4, %v1775_v31  ;;  %v819_v13 = vcombine.low %v708_v3, %v712_v5  ;;  %v820_v14 = vcombine.low %v716_v6, %v720_v7  ;;  %v728_v15 = vrot.slane %v677_v59, %v1754_v23 }
  0xe3   : > { %v613_v16 = vrot.slane %v599_v8, %v1775_v31  ;;  %v827_v18 = vrot.slane %v817_v9, %v1775_v31  ;;  %v834_v19 = vrot.slane %v818_v10, %v1775_v31  ;;  %v732_v21 = vrot.slane %v677_v59, %v1757_v24 }
  0xe4   : > { %v841_v33 = vrot.slane %v819_v13, %v1775_v31  ;;  %v848_v34 = vrot.slane %v820_v14, %v1775_v31  ;;  %v736_v35 = vrot.slane %v677_v59, %v1760_v25  ;;  %v740_v36 = vrot.slane %v677_v59, %v1763_v26 }
  0xe5   : > { %v614_v37 = vcombine.low %v606_v12, %v613_v16  ;;  %v849_v32 = vcombine.low %v827_v18, %v834_v19  ;;  %v744_v38 = vrot.slane %v677_v59, %v1766_v27  ;;  %v748_v39 = vrot.slane %v677_v59, %v1769_v28 }
  0xe6   : > { %v850_v40 = vcombine.low %v841_v33, %v848_v34  ;;  %v752_v41 = vrot.slane %v677_v59, %v1772_v29  ;;  %v866_v42 = vcombine.low %v724_v11, %v728_v15  ;;  %v867_v43 = vcombine.low %v732_v21, %v736_v35 }
  0xe7   : > { %625 = vperm.xlu1 %1468, %v614_v37   ;;  %v857_v44 = vrot.slane %v849_v32, %v1775_v31  ;;  %v868_v45 = vcombine.low %v740_v36, %v744_v38  ;;  %v756_v46 = vrot.slane %v680_v30, %v1751_v22  ;;  %v760_v47 = vrot.slane %v680_v30, %v1754_v23 }
  0xe8   : > { %v864_v48 = vrot.slane %v850_v40, %v1775_v31  ;;  %v869_v49 = vcombine.low %v748_v39, %v752_v41  ;;  %v876_v50 = vrot.slane %v866_v42, %v1775_v31  ;;  %v883_v51 = vrot.slane %v867_v43, %v1775_v31  ;;  %v1075_v42 = vld [vmem:[%s1985_s1] sm:$0xff]  ;;  %v1076_v43 = vld [vmem:[%s1985_s1 + $0x8] sm:$0xff] }
  0xe9   : > { %v890_v53 = vrot.slane %v868_v45, %v1775_v31  ;;  %v764_v54 = vrot.slane %v680_v30, %v1757_v24  ;;  %v768_v55 = vrot.slane %v680_v30, %v1760_v25  ;;  %v772_v56 = vrot.slane %v680_v30, %v1763_v26  ;;  %v1077_v45 = vld [vmem:[%s1985_s1 + $0x10] sm:$0xff] }
  0xea   : > { %v865_v57 = vcombine.low %v857_v44, %v864_v48  ;;  %v897_v58 = vrot.slane %v869_v49, %v1775_v31  ;;  %v898_v59 = vcombine.low %v876_v50, %v883_v51  ;;  %v776_v60 = vrot.slane %v680_v30, %v1766_v27 }
  0xeb   : > { %v780_v61 = vrot.slane %v680_v30, %v1769_v28  ;;  %v784_v62 = vrot.slane %v680_v30, %v1772_v29  ;;  %v915_v63 = vcombine.low %v756_v46, %v760_v47  ;;  %v916_v0 = vcombine.low %v764_v54, %v768_v55  ;;  %v1078_v46 = vld [vmem:[%s1985_s1 + $0x18] sm:$0xff] }
  0xec   : > { %1014 = vperm.xlu1 %1468, %v865_v57   ;;  %v899_v1 = vcombine.low %v890_v53, %v897_v58  ;;  %v906_v2 = vrot.slane %v898_v59, %v1775_v31  ;;  %v917_v3 = vcombine.low %v772_v56, %v776_v60  ;;  %v788_v4 = vrot.slane %v683_v52, %v1751_v22 }
  0xed   : > { %v918_v5 = vcombine.low %v780_v61, %v784_v62  ;;  %v925_v6 = vrot.slane %v915_v63, %v1775_v31  ;;  %v932_v7 = vrot.slane %v916_v0, %v1775_v31  ;;  %v792_v8 = vrot.slane %v683_v52, %v1754_v23 }
  0xee   : > { %v913_v9 = vrot.slane %v899_v1, %v1775_v31  ;;  %v939_v10 = vrot.slane %v917_v3, %v1775_v31  ;;  %v796_v11 = vrot.slane %v683_v52, %v1757_v24  ;;  %v800_v12 = vrot.slane %v683_v52, %v1760_v25 }
  0xef   : > { %v946_v13 = vrot.slane %v918_v5, %v1775_v31  ;;  %v947_v14 = vcombine.low %v925_v6, %v932_v7  ;;  %v804_v22 = vrot.slane %v683_v52, %v1763_v26  ;;  %v808_v15 = vrot.slane %v683_v52, %v1766_v27 }
  0xf0   : > { %v914_v16 = vcombine.low %v906_v2, %v913_v9  ;;  %v812_v18 = vrot.slane %v683_v52, %v1769_v28  ;;  %v816_v23 = vrot.slane %v683_v52, %v1772_v29  ;;  %v964_v19 = vcombine.low %v788_v4, %v792_v8 }
  0xf1   : > { %v948_v21 = vcombine.low %v939_v10, %v946_v13  ;;  %v955_v30 = vrot.slane %v947_v14, %v1775_v31  ;;  %v965_v33 = vcombine.low %v796_v11, %v800_v12  ;;  %v966_v24 = vcombine.low %v804_v22, %v808_v15 }
  0xf2   : > { %1017 = vperm.xlu1 %1468, %v914_v16   ;;  %v967_v25 = vcombine.low %v812_v18, %v816_v23  ;;  %v974_v34 = vrot.slane %v964_v19, %v1775_v31  ;;  %v1592_v38 = vmov 0.0   ;;  %v1593_v41 = vmov -inf  }
  0xf3   : > { %v962_v35 = vrot.slane %v948_v21, %v1775_v31  ;;  %v981_v26 = vrot.slane %v965_v33, %v1775_v31  ;;  %v988_v27 = vrot.slane %v966_v24, %v1775_v31  ;;  %264 = vst.msk [vmem:[#allocation2] sm:$0x1] %vm263_vm0, %v1592_v38  ;;  %1386 = vmatprep.subr.mxu1 %v1592_v38  ;;  %265 = vst.msk [vmem:[#allocation3] sm:$0x1] %vm263_vm0, %v1593_v41  ;;  %v1594_v47 = vmov 0.0|0.0  }
  0xf4   : > { %v995_v28 = vrot.slane %v967_v25, %v1775_v31  ;;  %v1392_v44 = vpack.c.bf16 %v1076_v43, %v1075_v42  ;;  %1391 = vmatprep.subr.bf16.mxu0 %v1594_v47  ;;  %1383 = vmatprep.mubr.msk.f32.mxu0 %vm1595_vm1, %v1592_v38  ;;  %v1395_v48 = vpack.c.bf16 %v1078_v46, %v1077_v45  ;;  %v628_v49 = vand.u32 127, %v291_v17  ;;  %v1161_v25 = vld [vmem:[%s1987_s3] sm:$0xf] }
  0xf5   : > { %v963_v36 = vcombine.low %v955_v30, %v962_v35  ;;  %v996_v29 = vcombine.low %v974_v34, %v981_v26  ;;  %1388 = vmatprep.mubr.msk.f32.mxu1 %vm1595_vm1, %v1592_v38  ;;  %1387 = vmatpush3.msk.msra.mxu1 %vm1173_vm7, %v1161_v25 }
  0xf6   : > { %v997_v37 = vcombine.low %v988_v27, %v995_v28  ;;  %1393 = vmatpush3.bf16.msra.mxu0 %v1392_v44  ;;  %v633_v50 = vadd.s32 4294967288, %v628_v49  ;;  %v640_v51 = vadd.s32 4294967280, %v628_v49  ;;  %v647_v54 = vadd.s32 4294967272, %v628_v49  ;;  %v1360_v28 = vld [vmem:[%s1988_s4] ss:$0 sm:$0xff] }
  0xf7   : > { %1020 = vperm.xlu1 %1468, %v963_v36   ;;  %v1004_v32 = vrot.slane %v996_v29, %v1775_v31  ;;  %1394 = vmatprep.subr.bf16.mxu0 %v1594_v47  ;;  %v631_v56 = vsub.s32 %v628_v49, %v1748_v20 }
  0xf8   : > { %v1011_v39 = vrot.slane %v997_v37, %v1775_v31  ;;  %v636_v53 = vsub.s32 %v633_v50, %v1748_v20  ;;  %v643_v55 = vsub.s32 %v640_v51, %v1748_v20  ;;  %v650_v60 = vsub.s32 %v647_v54, %v1748_v20 }
  0xfa   : > { %v1012_v40 = vcombine.low %v1004_v32, %v1011_v39  ;;  %1396 = vmatpush3.bf16.msra.mxu0 %v1395_v48  ;;  %v274_v5 = vld [vmem:[#allocation2] sm:$0x1]  ;;  %v684_v18 = vld [vmem:[#allocation3] sm:$0x1] }
  0xfc   : > { %1023 = vperm.xlu1 %1468, %v1012_v40  }
 0x157   : > { %v617_v58 = vpop.permute.xlu0 %616 }
 0x158   : > { %v632_v62 = vrot.slane %v617_v58, %v631_v56 }
 0x15d   : > { %v620_v52 = vpop.permute.xlu1 %619 }
 0x15e   : > { %v637_v59 = vrot.slane %v620_v52, %v636_v53 }
 0x160   : > { %v639_v63 = vsel %vm638_vm2, %v637_v59, %v632_v62 }
 0x161   : > { %v623_v57 = vpop.permute.xlu1 %622 }
 0x162   : > { %v644_v61 = vrot.slane %v623_v57, %v643_v55 }
 0x164   : > { %v646_v1 = vsel %vm645_vm3, %v644_v61, %v639_v63 }
 0x166   : > { %v626_v17 = vpop.permute.xlu1 %625 }
 0x167   : > { %v651_v0 = vrot.slane %v626_v17, %v650_v60 }
 0x169   : > { %v653_v2 = vsel %vm652_vm4, %v651_v0, %v646_v1 }
 0x16a   : > { %v660_v3 = vrot.slane %v653_v2, %v1775_v31 }
 0x16b   : > { %v1015_v4 = vpop.permute.xlu1 %1014 }
 0x16c   : > { %v667_v6 = vrot.slane %v660_v3, %v1775_v31  ;;  %v1028_v11 = vrot.slane %v1015_v4, %v631_v56 }
 0x16e   : > { %v669_v20 = vadd.f32 %v667_v6, %v274_v5 }
 0x170   : > { %671 = vst.msk [vmem:[#allocation2] sm:$0x1] %vm263_vm0, %v669_v20 }
 0x171   : > { %v1018_v7 = vpop.permute.xlu1 %1017 }
 0x172   : > { %v1032_v9 = vrot.slane %v1018_v7, %v636_v53 }
 0x174   : > { %v1033_v13 = vsel %vm638_vm2, %v1032_v9, %v1028_v11 }
 0x176   : > { %v1021_v8 = vpop.permute.xlu1 %1020 }
 0x177   : > { %v1037_v10 = vrot.slane %v1021_v8, %v643_v55  ;;  %v1064_v21 = vld [vmem:[#allocation2] sm:$0x1] }
 0x178   : > { %v1065_v30 = vmul.f32 0.00390625, %v1064_v21 }
 0x179   : > { %v1038_v22 = vsel %vm645_vm3, %v1037_v10, %v1033_v13 }
 0x17b   : > { %v1024_v12 = vpop.permute.xlu1 %1023 }
 0x17c   : > { %v1042_v14 = vrot.slane %v1024_v12, %v650_v60 }
 0x17e   : > { %v1043_v15 = vsel %vm652_vm4, %v1042_v14, %v1038_v22 }
 0x17f   : > { %v1050_v16 = vrot.slane %v1043_v15, %v1775_v31 }
 0x181   : > { %v1057_v23 = vrot.slane %v1050_v16, %v1775_v31  ;;  %v1358_v31 = vld [vmem:[%s1986_s2] ss:$0 sm:$0xff] }
 0x183   : > { %v1059_v19 = vmax.f32 %v684_v18, %v1057_v23 }
 0x185   : > { %1060 = vst.msk [vmem:[#allocation3] sm:$0x1] %vm263_vm0, %v1059_v19 }
 0x18c   : > { %v1357_v33 = vld [vmem:[#allocation3] ss:$0 sm:$0xff] }
 0x18d   : > { %v1074_v24 = vsel %vm1073_vm5, %v1065_v30, %v1357_v33 }
 0x18e   : > { %1384 = vmatmul.mubr.msk.f32.vlgmr.msra.gmra.mrb[0].mxu0 %vm1086_vm6, %v1074_v24 }
 0x261   : > { %v1156_v34 = vpop.f32.mrb[0].mxu0 }
 0x262   : > { %v1157_v35 = vadd.f32 %v1358_v31, %v1156_v34  ;;  %v1385_v26 = vpop.f32.mrb[1].mxu0 }
 0x264   : > { %v1160_v27 = vmax.f32 %v1157_v35, 0.0 }
 0x266   : > { %1389 = vmatmul.mubr.msk.f32.vlgmr.msra.gmra.mrb[0].mxu1 %vm1169_vm8, %v1160_v27 }
 0x339   : > { %v1243_v36 = vpop.f32.mrb[0].mxu1 }
 0x33a   : > { %v1244_v29 = vadd.f32 %v1360_v28, %v1243_v36  ;;  %v1390_v37 = vpop.f32.mrb[1].mxu1 }
 0x33c   : > { %v1248_v32 = vrot.slane %v1244_v29, 1 }
 0x33e   : > { %v1250_v38 = vadd.f32 %v1248_v32, %v1244_v29 }
 0x340   : > { %v1363_v39 = vmul.f32 -1.442695, %v1250_v38 }
 0x342   : > { %1469 = vpow2.f32 %v1363_v39 }
 0x34c   : > { %v1470_v40 = vpop.eup %1469 }
 0x34d   : > { %v1254_v41 = vadd.f32 1.0, %v1470_v40 }
 0x34f   : > { %1471 = vrcp.f32 %v1254_v41 }
 0x359   : > { %v1472_v42 = vpop.eup %1471 }
 0x35a   : > { %1257 = vst.msk [vmem:[%s257_s14] sm:$0x1] %vm263_vm0, %v1472_v42 }
 0x35b   : > { %1516 = shalt.err (!%p1513_p5)
}
 0x35c   : > { %s1517_s29 = scalar_lea.hbm %s1934_s9, 16  ;;  %s1521_s10 = scalar_lea.hbm %s1989_s5, 32 }
 0x35d   : > { %p1518_p4 = scmp.ne.s32.totalorder %s1934_s9, %s1517_s29  ;;  %p1522_p12 = scmp.lt.u32.totalorder %s1934_s9, %s1989_s5 }
 0x35e   : > { %p1523_p1 = scmp.lt.u32.totalorder %s1521_s10, %s1517_s29  ;;  %p1525_p8 = scmp.lt.u32.totalorder %s1517_s29, %s1934_s9 }
 0x35f   : > { %p1519_p7 = pnand %p1518_p4, %p1997_p9 }
 0x360   : > { %p1524_p3 = por %p1523_p1, %p1522_p12 }
 0x361   : > { %p1520_p10 = pneg %p1519_p7 }
 0x362   : > { %p1526_p11 = por %p1525_p8, %p1524_p3 }
 0x364   : > { %p1527_p0 = pnand %p1526_p11, %p1520_p10 }
 0x366   : > { %1530 = shalt.err (!%p1527_p0)
}
 0x367   : > { %1399 = dma.vmem_to_hbm [thread:$0]  (%p1997_p9), %s1936_s16, 16, %s1934_s9, %s1259_s12  }
 0x368 PF: > { %s1283_s14 = sand.u32 1, %s1565_s18   ;;  %p1998_p6 = scmp.ne.s32.totalorder %s1994_s8, 0 }
 0x369   : > { %p1999_p13 = scmp.ge.s32.totalorder %s1585_s23, 2  ;;  %s1284_s17 = scalar_lea.sflag [#allocation6], %s1283_s14 }
 0x36b   : > { %p1406_p2 = pnand %p1999_p13, %p1998_p6 }
 0x36d   : > { %1560 = dma.done.wait (!%p1406_p2), %s1284_s17, 16  }
 0x36e   : > { %1562 = vsyncadd (!%p1406_p2), %s1284_s17, 4294967280  ;;  %s21_s23 = sadd.s32 1, %s1585_s23   ;;  %s2000_s18 = smov %s1569_s19 }
 0x36f   : > { %p18_p5 = scmp.ge.s32.totalorder %s21_s23, 4   ;;  %s2001_s19 = smov %s1573_s20 }
 0x370   : > { %s2002_s20 = smov %s1683_s7  ;;  %s2003_s21 = smov %s1581_s22 }
 0x371   : > { %s2004_s22 = smov %s2006_s26  ;;  %20 = sbr.rel (!%p18_p5) target bundleno = 6 (0x6), region = 93 }
 0x378   :  { %1288 = vsyncpa [#allocation5], 1 }
 0x379   :  { %1290 = vsyncpa [#allocation5 + $0x1], 1 }
 0x37a   :  { %1291 = vsyncpa [#allocation6], 1 }
 0x37b   :  { %1293 = vsyncpa [#allocation6 + $0x1], 1 }

</bundles_post_ra>
